<compile_context>
chip_gen: v7x
topology: tpu7x:2x2x1
jax: 0.10.0
libtpu: 0.0.40
codegen_flags: <defaults>
</compile_context>

<pallas_src>
import functools

import jax
import jax.numpy as jnp
from jax import lax
from jax.experimental import pallas as pl
from jax.experimental.pallas import tpu as pltpu

BN_EPS = 1e-5
LANE = 128
SUBLANE_BF16 = 16


def _round_up(x, m):
    return ((x + m - 1) // m) * m


def _pad2(a, shape, dtype):
    out = jnp.zeros(shape, dtype)
    return out.at[: a.shape[0], : a.shape[1]].set(a.astype(dtype))


def _decoder_kernel(z_ref, w_ref, g_ref, b_ref, o_ref, act_ref, *,
                    n_rows, n_pad, f_pad, num_layers):
    """One grid step == one [Linear -> BatchNorm1d(train) -> ReLU] layer.

    z_ref   : (N_pad, K_pad) bf16     resident input (padded rows/cols are zero)
    w_ref   : (1, K_pad, F_pad) bf16  streamed per-layer weight, stored (in, out)
    g_ref   : (1, 1, F_pad)  f32      gamma (zero on padded features)
    b_ref   : (1, 1, F_pad)  f32      beta  (zero on padded features)
    o_ref   : (N_pad, F_pad) out dt   resident output, written at the last layer
    act_ref : (N_pad, K_pad) bf16     activation carried across the layer axis
    """
    l = pl.program_id(0)

    @pl.when(l == 0)
    def _():
        # Seed the carried activation with z (zero padding included, so the K_pad > F_pad
        # tail of act_ref stays zero for every subsequent layer).
        act_ref[...] = z_ref[...]

    x = act_ref[...]                                        # (N_pad, K_pad) bf16
    w = w_ref[0]                                            # (K_pad, F_pad) bf16
    # Linear (no bias): bf16 operands, f32 accumulation on the MXU.
    h = jnp.dot(x, w, preferred_element_type=jnp.float32)   # (N_pad, F_pad) f32

    # BatchNorm1d (training mode), one-pass batch statistics over the true batch rows.
    # Padded batch rows of x are kept at exactly zero, so they contribute nothing to s1/s2.
    inv_n = jnp.float32(1.0 / n_rows)
    s1 = jnp.sum(h, axis=0, keepdims=True)
    s2 = jnp.sum(h * h, axis=0, keepdims=True)
    mean = s1 * inv_n
    var = jnp.maximum(s2 * inv_n - mean * mean, 0.0)        # biased variance
    # TODO(synk): switch to a centered second pass (or per-chunk Welford) if one-pass
    # E[h^2]-mean^2 cancellation becomes a problem for deep stacks / tight tolerances.
    scale = lax.rsqrt(var + BN_EPS) * g_ref[0]              # gamma folded into inv_std (1,F)
    shift = b_ref[0] - mean * scale                         # -mean*scale folded into beta (1,F)

    y = jnp.maximum(h * scale + shift, 0.0)                 # BN affine + ReLU
    # TODO(synk): for large F_pad, chunk this epilogue along F in a lax.fori_loop and issue
    # the next layer's partial matmul per finished K-chunk to overlap VPU epilogue with MXU.

    if n_pad > n_rows:
        # Padded batch rows become nonzero after BN+ReLU (max(shift, 0)); re-zero them so the
        # next layer's statistics stay exact.
        row_ids = lax.broadcasted_iota(jnp.int32, (n_pad, 1), 0)
        y = jnp.where(row_ids < n_rows, y, 0.0)

    # Carry for the next layer (bf16 operand for the next matmul). The K_pad > F_pad tail of
    # act_ref is never rewritten and stays zero (seeded from the zero-padded z at layer 0).
    act_ref[:, :f_pad] = y.astype(jnp.bfloat16)

    @pl.when(l == num_layers - 1)
    def _():
        o_ref[...] = y.astype(o_ref.dtype)


def prepare_decoder_params(params):
    """ONE-TIME padding / casting / stacking of per-layer parameters (not per forward call).

    params: list of (w(in, out), gamma(1, out), beta(1, out)) f32 arrays.
    Returns (w_stack (L, K_pad, F_pad) bf16, gamma_stack (L, 1, F_pad) f32,
             beta_stack (L, 1, F_pad) f32, f_out, k_pad).
    """
    f_out = params[0][0].shape[1]
    f_pad = _round_up(f_out, LANE)
    k_pad = max(_round_up(w.shape[0], LANE) for (w, _, _) in params)
    k_pad = max(k_pad, f_pad)

    w_stack = jnp.stack([_pad2(w, (k_pad, f_pad), jnp.bfloat16) for (w, _, _) in params])
    g_stack = jnp.stack([_pad2(g, (1, f_pad), jnp.float32) for (_, g, _) in params])
    b_stack = jnp.stack([_pad2(b, (1, f_pad), jnp.float32) for (_, _, b) in params])
    return w_stack, g_stack, b_stack, f_out, k_pad


def _vmem_limit_bytes(n_pad, k_pad, f_pad, out_itemsize):
    resident = (
        2 * n_pad * k_pad * 2                 # z input (conservatively double buffered)
        + 2 * k_pad * f_pad * 2               # streamed weight block, 2 pipeline buffers
        + 2 * 2 * f_pad * 4                   # gamma + beta blocks, 2 buffers each
        + 2 * n_pad * f_pad * out_itemsize    # output block
        + n_pad * k_pad * 2                   # activation scratch
    )
    needed = int(resident * 1.5) + (4 << 20)  # headroom for compiler temporaries / spills
    try:
        cap = pltpu.get_tpu_info().vmem_capacity_bytes
    except Exception:                         # conservative v7x-safe fallback
        cap = 64 << 20
    ceiling = int(cap * 0.85)
    return max(min(needed, ceiling), 16 << 20)


@functools.partial(jax.jit, static_argnames=("f_out", "out_dtype"))
def latent_space_decoder_forward(z, w_stack, g_stack, b_stack, *, f_out,
                                 out_dtype=jnp.float32):
    """z: (N, latent_space_size) f32; stacked params from prepare_decoder_params."""
    n = z.shape[0]
    num_layers, k_pad, f_pad = w_stack.shape
    n_pad = _round_up(max(n, SUBLANE_BF16), SUBLANE_BF16)   # bf16 LHS sublane packing

    z_p = _pad2(z, (n_pad, k_pad), jnp.bfloat16)

    kernel = functools.partial(
        _decoder_kernel, n_rows=n, n_pad=n_pad, f_pad=f_pad, num_layers=num_layers)

    out_p = pl.pallas_call(
        kernel,
        out_shape=jax.ShapeDtypeStruct((n_pad, f_pad), out_dtype),
        grid=(num_layers,),
        in_specs=[
            pl.BlockSpec((n_pad, k_pad), lambda l: (0, 0)),        # z: resident
            pl.BlockSpec((1, k_pad, f_pad), lambda l: (l, 0, 0)),  # weight: streamed per layer
            pl.BlockSpec((1, 1, f_pad), lambda l: (l, 0, 0)),      # gamma
            pl.BlockSpec((1, 1, f_pad), lambda l: (l, 0, 0)),      # beta
        ],
        out_specs=pl.BlockSpec((n_pad, f_pad), lambda l: (0, 0)),
        scratch_shapes=[pltpu.VMEM((n_pad, k_pad), jnp.bfloat16)],
        compiler_params=pltpu.CompilerParams(
            dimension_semantics=("arbitrary",),
            vmem_limit_bytes=_vmem_limit_bytes(
                n_pad, k_pad, f_pad, jnp.dtype(out_dtype).itemsize),
        ),
    )(z_p, w_stack, g_stack, b_stack)

    # TODO(synk): for v7x dual-TensorCore use, split into per-layer feature-tiled kernels
    # (dimension_semantics=("parallel", "arbitrary")); the fully fused form needs the whole
    # previous activation as the next layer's K dim, so a parallel F axis inside one kernel
    # would require a cross-core exchange.
    return out_p[:n, :f_out]


def init_latent_space_decoder_params(key, n_layers, latent_space_size, out_features):
    """Deterministic synthetic params mirroring the module's __init__ shapes."""
    params = []
    for i in range(n_layers + 1):
        cur_features = latent_space_size if i == 0 else out_features
        key, kw, kg, kb = jax.random.split(key, 4)
        # Linear weight (PyTorch shape (out, in)) stored transposed as (in, out).
        w = (jax.random.normal(kw, (cur_features, out_features), jnp.float32)
             * (1.0 / jnp.sqrt(cur_features)))
        # BatchNorm affine params (PyTorch default gamma=1, beta=0); perturbed but deterministic.
        gamma = 1.0 + 0.1 * jax.random.normal(kg, (1, out_features), jnp.float32)
        beta = 0.1 * jax.random.normal(kb, (1, out_features), jnp.float32)
        params.append((w, gamma, beta))
    return params


def latent_space_decoder_reference_f32(z, params):
    """Pure-JAX f32 reference mirroring PyTorch training-mode forward exactly."""
    x = z
    for (w, gamma, beta) in params:
        h = x @ w
        mean = jnp.mean(h, axis=0, keepdims=True)
        var = jnp.mean((h - mean) ** 2, axis=0, keepdims=True)  # biased var (training BN)
        y = (h - mean) * lax.rsqrt(var + BN_EPS) * gamma + beta
        x = jnp.maximum(y, 0.0)
    return x


def latent_space_decoder_reference_bf16(z, params):
    """Pure-JAX reference using the same bf16-matmul / folded-BN math as the kernel."""
    n = z.shape[0]
    inv_n = jnp.float32(1.0 / n)
    x_bf16 = z.astype(jnp.bfloat16)
    x = None
    for (w, gamma, beta) in params:
        h = jnp.dot(x_bf16, w.astype(jnp.bfloat16), preferred_element_type=jnp.float32)
        mean = jnp.sum(h, axis=0, keepdims=True) * inv_n
        var = jnp.maximum(jnp.sum(h * h, axis=0, keepdims=True) * inv_n - mean * mean, 0.0)
        scale = lax.rsqrt(var + BN_EPS) * gamma
        shift = beta - mean * scale
        x = jnp.maximum(h * scale + shift, 0.0)
        x_bf16 = x.astype(jnp.bfloat16)
    return x


if __name__ == "__main__":
    n_layers = 2
    latent_space_size = 16
    out_features = 32
    batch = 8

    key = jax.random.PRNGKey(0)
    key, kz = jax.random.split(key)
    z = jax.random.normal(kz, (batch, latent_space_size), jnp.float32)

    params = init_latent_space_decoder_params(key, n_layers, latent_space_size, out_features)

    # One-time parameter preparation (padding / bf16 cast / stacking) — NOT per forward call.
    w_stack, g_stack, b_stack, f_out, _ = prepare_decoder_params(params)

    out = latent_space_decoder_forward(z, w_stack, g_stack, b_stack, f_out=f_out)
    out = jax.block_until_ready(out)
    assert out.shape == (batch, out_features), out.shape

    # Tight check against a reference that uses the identical bf16-matmul / folded-BN math.
    ref_bf16 = latent_space_decoder_reference_bf16(z, params)
    assert jnp.allclose(out, ref_bf16, atol=2e-2, rtol=2e-2), (
        float(jnp.max(jnp.abs(out - ref_bf16))))

    # Sanity check against the full-f32 PyTorch-semantics reference (loose tolerance:
    # bf16 matmul operands introduce small drift across the 3 stacked layers).
    ref_f32 = latent_space_decoder_reference_f32(z, params)
    assert jnp.allclose(out, ref_f32, atol=2.5e-1, rtol=2.5e-1), (
        float(jnp.max(jnp.abs(out - ref_f32))))

    print("KERNEL_OK")
</pallas_src>

<mosaic_0001>
module attributes {stable_mosaic.version = 11 : i64} {
  func.func @_decoder_kernel(%arg0: i32, %arg1: memref<16x128xbf16, #tpu.memory_space<vmem>>, %arg2: memref<1x128x128xbf16, #tpu.memory_space<vmem>>, %arg3: memref<1x1x128xf32, #tpu.memory_space<vmem>>, %arg4: memref<1x1x128xf32, #tpu.memory_space<vmem>>, %arg5: memref<16x128xf32, #tpu.memory_space<vmem>>, %arg6: memref<16x128xbf16, #tpu.memory_space<vmem>>) attributes {dimension_semantics = [#tpu.dimension_semantics<arbitrary>], iteration_bounds = array<i64: 3>, scalar_prefetch = 0 : i64, scratch_operands = 1 : i64, tpu.core_type = #tpu.core_type<tc>, window_params = [{pipeline_mode = #tpu.pipeline_mode<synchronous>, transform_indices = @transform_0, window_bounds = array<i64: 16, 128>}, {transform_indices = @transform_1, window_bounds = array<i64: 1, 128, 128>}, {transform_indices = @transform_2, window_bounds = array<i64: 1, 1, 128>}, {transform_indices = @transform_3, window_bounds = array<i64: 1, 1, 128>}, {pipeline_mode = #tpu.pipeline_mode<synchronous>, transform_indices = @transform_4, window_bounds = array<i64: 16, 128>}]} {
    %c0_i32 = arith.constant 0 : i32
    %0 = arith.cmpi eq, %arg0, %c0_i32 : i32
    %1 = arith.extui %0 : i1 to i32
    %c0_i32_0 = arith.constant 0 : i32
    %2 = arith.cmpi ne, %1, %c0_i32_0 : i32
    scf.if %2 {
      %c0_22 = arith.constant 0 : index
      %c0_23 = arith.constant 0 : index
      %48 = vector.load %arg1[%c0_22, %c0_23] : memref<16x128xbf16, #tpu.memory_space<vmem>>, vector<16x128xbf16>
      %c0_24 = arith.constant 0 : index
      %c0_25 = arith.constant 0 : index
      %49 = vector.load %arg6[%c0_24, %c0_25] : memref<16x128xbf16, #tpu.memory_space<vmem>>, vector<16x128xbf16>
      tpu.vector_store %arg6[%c0_24, %c0_25], %48 {strides = array<i32>} : memref<16x128xbf16, #tpu.memory_space<vmem>>, vector<16x128xbf16>,
    } else {
    }
    %c0 = arith.constant 0 : index
    %c0_1 = arith.constant 0 : index
    %3 = vector.load %arg6[%c0, %c0_1] : memref<16x128xbf16, #tpu.memory_space<vmem>>, vector<16x128xbf16>
    %c0_2 = arith.constant 0 : index
    %c0_3 = arith.constant 0 : index
    %c0_4 = arith.constant 0 : index
    %4 = vector.load %arg2[%c0_2, %c0_3, %c0_4] : memref<1x128x128xbf16, #tpu.memory_space<vmem>>, vector<1x128x128xbf16>
    %5 = vector.shape_cast %4 : vector<1x128x128xbf16> to vector<128x128xbf16>
    %cst = arith.constant dense<0.000000e+00> : vector<16x128xf32>
    %6 = tpu.matmul %3, %5, %cst {dimension_numbers = #tpu.dot_dimension_numbers<[1], [0], [0], [1], [0, 0, 1, 1], [], []>} : vector<16x128xbf16>, vector<128x128xbf16>, vector<16x128xf32> -> vector<16x128xf32>
    %cst_5 = arith.constant dense<0.000000e+00> : vector<128xf32>
    %7 = vector.multi_reduction <add>, %6, %cst_5 [0] : vector<16x128xf32> to vector<128xf32>
    %8 = vector.shape_cast %7 : vector<128xf32> to vector<1x128xf32>
    %9 = arith.mulf %6, %6 : vector<16x128xf32>
    %cst_6 = arith.constant dense<0.000000e+00> : vector<128xf32>
    %10 = vector.multi_reduction <add>, %9, %cst_6 [0] : vector<16x128xf32> to vector<128xf32>
    %11 = vector.shape_cast %10 : vector<128xf32> to vector<1x128xf32>
    %cst_7 = arith.constant 1.250000e-01 : f32
    %12 = vector.broadcast %cst_7 : f32 to vector<1x128xf32>
    %13 = arith.mulf %8, %12 : vector<1x128xf32>
    %cst_8 = arith.constant 1.250000e-01 : f32
    %14 = vector.broadcast %cst_8 : f32 to vector<1x128xf32>
    %15 = arith.mulf %11, %14 : vector<1x128xf32>
    %16 = arith.mulf %13, %13 : vector<1x128xf32>
    %17 = arith.subf %15, %16 : vector<1x128xf32>
    %cst_9 = arith.constant 0.000000e+00 : f32
    %18 = vector.broadcast %cst_9 : f32 to vector<1x128xf32>
    %19 = arith.maximumf %17, %18 : vector<1x128xf32>
    %cst_10 = arith.constant 9.99999974E-6 : f32
    %20 = vector.broadcast %cst_10 : f32 to vector<1x128xf32>
    %21 = arith.addf %19, %20 : vector<1x128xf32>
    %22 = math.rsqrt %21 : vector<1x128xf32>
    %c0_11 = arith.constant 0 : index
    %c0_12 = arith.constant 0 : index
    %c0_13 = arith.constant 0 : index
    %23 = vector.load %arg3[%c0_11, %c0_12, %c0_13] : memref<1x1x128xf32, #tpu.memory_space<vmem>>, vector<1x1x128xf32>
    %24 = vector.shape_cast %23 : vector<1x1x128xf32> to vector<1x128xf32>
    %25 = arith.mulf %22, %24 : vector<1x128xf32>
    %c0_14 = arith.constant 0 : index
    %c0_15 = arith.constant 0 : index
    %c0_16 = arith.constant 0 : index
    %26 = vector.load %arg4[%c0_14, %c0_15, %c0_16] : memref<1x1x128xf32, #tpu.memory_space<vmem>>, vector<1x1x128xf32>
    %27 = vector.shape_cast %26 : vector<1x1x128xf32> to vector<1x128xf32>
    %28 = arith.mulf %13, %25 : vector<1x128xf32>
    %29 = arith.subf %27, %28 : vector<1x128xf32>
    %30 = vector.broadcast %25 : vector<1x128xf32> to vector<16x128xf32>
    %31 = arith.mulf %6, %30 : vector<16x128xf32>
    %32 = vector.broadcast %29 : vector<1x128xf32> to vector<16x128xf32>
    %33 = arith.addf %31, %32 : vector<16x128xf32>
    %cst_17 = arith.constant 0.000000e+00 : f32
    %34 = vector.broadcast %cst_17 : f32 to vector<16x128xf32>
    %35 = arith.maximumf %33, %34 : vector<16x128xf32>
    %36 = tpu.iota {dimensions = array<i32: 0>} : vector<16x1xi32>
    %c8_i32 = arith.constant 8 : i32
    %37 = vector.broadcast %c8_i32 : i32 to vector<16x1xi32>
    %38 = arith.cmpi slt, %36, %37 : vector<16x1xi32>
    %cst_18 = arith.constant 0.000000e+00 : f32
    %39 = vector.shape_cast %38 : vector<16x1xi1> to vector<16x1xi1>
    %40 = vector.broadcast %39 : vector<16x1xi1> to vector<16x128xi1>
    %41 = vector.broadcast %cst_18 : f32 to vector<16x128xf32>
    %42 = arith.select %40, %35, %41 : vector<16x128xi1>, vector<16x128xf32>
    %43 = arith.truncf %42 : vector<16x128xf32> to vector<16x128xbf16>
    %c0_19 = arith.constant 0 : index
    %c0_20 = arith.constant 0 : index
    %44 = vector.load %arg6[%c0_19, %c0_20] : memref<16x128xbf16, #tpu.memory_space<vmem>>, vector<16x128xbf16>
    tpu.vector_store %arg6[%c0_19, %c0_20], %43 {strides = array<i32>} : memref<16x128xbf16, #tpu.memory_space<vmem>>, vector<16x128xbf16>,
    %c2_i32 = arith.constant 2 : i32
    %45 = arith.cmpi eq, %arg0, %c2_i32 : i32
    %46 = arith.extui %45 : i1 to i32
    %c0_i32_21 = arith.constant 0 : i32
    %47 = arith.cmpi ne, %46, %c0_i32_21 : i32
    scf.if %47 {
      %c0_22 = arith.constant 0 : index
      %c0_23 = arith.constant 0 : index
      %48 = vector.load %arg5[%c0_22, %c0_23] : memref<16x128xf32, #tpu.memory_space<vmem>>, vector<16x128xf32>
      tpu.vector_store %arg5[%c0_22, %c0_23], %42 {strides = array<i32>} : memref<16x128xf32, #tpu.memory_space<vmem>>, vector<16x128xf32>,
    } else {
    }
    return
  }
  func.func @transform_0(%arg0: i32) -> (i32, i32) {
    %c0_i32 = arith.constant 0 : i32
    %c0_i32_0 = arith.constant 0 : i32
    %c0_i32_1 = arith.constant 0 : i32
    return %c0_i32, %c0_i32_0 : i32, i32
  }
  func.func @transform_1(%arg0: i32) -> (i32, i32, i32) {
    %c0_i32 = arith.constant 0 : i32
    %c0_i32_0 = arith.constant 0 : i32
    %c0_i32_1 = arith.constant 0 : i32
    return %arg0, %c0_i32, %c0_i32_0 : i32, i32, i32
  }
  func.func @transform_2(%arg0: i32) -> (i32, i32, i32) {
    %c0_i32 = arith.constant 0 : i32
    %c0_i32_0 = arith.constant 0 : i32
    %c0_i32_1 = arith.constant 0 : i32
    return %arg0, %c0_i32, %c0_i32_0 : i32, i32, i32
  }
  func.func @transform_3(%arg0: i32) -> (i32, i32, i32) {
    %c0_i32 = arith.constant 0 : i32
    %c0_i32_0 = arith.constant 0 : i32
    %c0_i32_1 = arith.constant 0 : i32
    return %arg0, %c0_i32, %c0_i32_0 : i32, i32, i32
  }
  func.func @transform_4(%arg0: i32) -> (i32, i32) {
    %c0_i32 = arith.constant 0 : i32
    %c0_i32_0 = arith.constant 0 : i32
    %c0_i32_1 = arith.constant 0 : i32
    return %c0_i32, %c0_i32_0 : i32, i32
  }
}

</mosaic_0001>

<bundles_post_ra>
// kernel: latent_space_decoder_forward.1
= control target key start
LH: loop header
LB: loop body
LE: loop exit
PB: predicated region body
PF: predicated region fallthrough
CT: control target
= control target key end

     0   :  { %9 = vsyncpa [#allocation4], 0  ;;  %s830_s0 = inlined_call_operand.vmem [shape: bf16[16,128], index: 0, kind: input, shape index: {}]   ;;  %s831_s1 = inlined_call_operand.hbm [shape: bf16[3,128,128], index: 1, kind: input, shape index: {}]   ;;  %s832_s2 = inlined_call_operand.vmem [shape: f32[3,1,128], index: 2, kind: input, shape index: {}]   ;;  %s833_s3 = inlined_call_operand.vmem [shape: f32[3,1,128], index: 3, kind: input, shape index: {}]   ;;  %s834_s4 = inlined_call_operand.vmem [shape: f32[16,128], index: 4, kind: output, shape index: {}]  }
   0x1   :  { %11 = vsyncpa [#allocation4 + $0x1], 0  ;;  %s674_s15 = smov 0   ;;  %s676_s16 = smov 0  }
   0x2   :  { %s678_s17 = smov 0   ;;  %s680_s18 = smov 0  }
   0x3 LB: > { %s693_s19 = sadd.s32 4294967295, %s641_s18   ;;  %s696_s20 = sadd.s32 1, %s641_s18   ;;  %s641_s18 = sphi %s680_s18, %s841_s18   ;;  %s637_s17 = sphi %s678_s17, %s840_s17   ;;  %s633_s16 = sphi %s676_s16, %s839_s16   ;;  %s629_s15 = sphi %s674_s15, %s838_s15  }
   0x4   : > { %s42_s21 = ssub.s32 %s641_s18, %s696_s20  ;;  %s45_s22 = sadd.s32 1, %s637_s17 }
   0x5   : > { %p43_p0 = scmp.eq.s32.totalorder %s42_s21, 0  ;;  %p52_p1 = scmp.ne.s32.totalorder %s637_s17, %s633_s16 }
   0x6   : > { %p53_p2 = scmp.eq.s32.totalorder %s641_s18, 0  ;;  %p58_p3 = scmp.ne.s32.totalorder %s633_s16, %s629_s15 }
   0x7   : > { %s706_s23 = scalar_select %p43_p0, %s637_s17, %s45_s22  }
   0x8   : > { %p54_p4 = por %p53_p2, %p52_p1  ;;  %p59_p5 = scmp.eq.s32.totalorder %s693_s19, 0 }
   0x9   : > { %p528_p6 = scmp.lt.s32.totalorder %s641_s18, 3  ;;  %s158_s25 = sand.u32 1, %s637_s17  }
   0xa   : > { %p710_p7 = por %p59_p5, %p58_p3  ;;  %s474_s26 = sshll.u32 %s158_s25, 6 }
   0xb   : > { %s492_s27 = sshll.u32 %s641_s18, 10  ;;  %s162_s5 = scalar_lea.vmem [#allocation3], %s474_s26 }
   0xc   : > { %s719_s30 = scalar_lea.hbm %s831_s1, %s492_s27  ;;  %s169_s6 = sshll.u32 %s162_s5, 4  ;;  %s721_s6 = int_to_ptr.vmem [resolvable:$true] %s169_s6 }
   0xd   : > { %p723_p8 = pnand %p528_p6, %p54_p4  ;;  %s728_s8 = scalar_lea.sflag [#allocation4], %s158_s25 }
   0xe   : > { %s577_s9 = scalar_lea.hbm %s719_s30, 1024  ;;  %s582_s12 = scalar_lea.hbm %s831_s1, 3072 }
   0xf   : > { %p578_p10 = scmp.ne.s32.totalorder %s719_s30, %s577_s9  ;;  %p579_p11 = pneg %p723_p8 }
  0x10   : > { %p583_p0 = scmp.lt.u32.totalorder %s719_s30, %s831_s1  ;;  %p584_p1 = scmp.lt.u32.totalorder %s582_s12, %s577_s9 }
  0x11   : > { %p580_p12 = pnand %p579_p11, %p578_p10  ;;  %p586_p3 = scmp.lt.u32.totalorder %s577_s9, %s719_s30 }
  0x12   : > { %p585_p2 = por %p584_p1, %p583_p0 }
  0x13   : > { %p581_p13 = pneg %p580_p12 }
  0x14   : > { %p587_p4 = por %p586_p3, %p585_p2 }
  0x16   : > { %p588_p5 = pnand %p587_p4, %p581_p13 }
  0x18   : > { %591 = shalt.err (!%p588_p5)
}
  0x19   : > { %s592_s15 = scalar_lea.vmem %s721_s6, 1024  ;;  %s643_s21 = smov [#allocation3]  }
  0x1a   : > { %p593_p6 = scmp.ne.s32.totalorder %s721_s6, %s592_s15  ;;  %s597_s22 = sshll.u32 %s643_s21, 4  ;;  %s598_s22 = int_to_ptr.vmem [resolvable:$false] %s597_s22 }
  0x1b   : > { %s599_s25 = scalar_lea.vmem %s598_s22, 2048  ;;  %p600_p9 = scmp.lt.s32.totalorder %s721_s6, %s598_s22 }
  0x1c   : > { %p595_p10 = pnand %p593_p6, %p579_p11  ;;  %p601_p0 = scmp.lt.s32.totalorder %s599_s25, %s592_s15 }
  0x1e   : > { %p596_p12 = pneg %p595_p10  ;;  %p602_p1 = por %p601_p0, %p600_p9 }
  0x20   : > { %p603_p2 = pnand %p602_p1, %p596_p12 }
  0x22   : > { %606 = shalt.err (!%p603_p2)
}
  0x23   : > { %s644_s26 = smov 64   ;;  %s645_s27 = smov 4  }
  0x24   : > { %527 = dma.hbm_to_vmem [thread:$0]  (!%p723_p8), %s719_s30, 1024, %s721_s6, %s728_s8, %s644_s26, %s644_s26, %s645_s27  }
  0x25   : > { %p189_p11 = scmp.lt.s32.totalorder %s641_s18, 4  ;;  %p837_p13 = scmp.ge.s32.totalorder %s641_s18, 1 }
  0x27   : > { %p190_p3 = pnand %p837_p13, %p189_p11 }
  0x28   : > { %s195_s28 = sand.u32 (!%p190_p3), 1, %s633_s16  }
  0x29   : > { %193 = sbr.rel (%p190_p3) target bundleno = 356 (0x164), region = 36  ;;  %s478_s29 = sshll.u32 (!%p190_p3), %s195_s28, 6 }
  0x2a   : > { %s196_s5 = scalar_lea.sflag (!%p190_p3), [#allocation4], %s195_s28  ;;  %s760_s9 = scalar_lea.vmem (!%p190_p3), [#allocation3], %s478_s29 }
  0x30   : > { %624 = dma.done.wait (%p710_p7), %s196_s5, 1024  }
  0x31   : > { %626 = vsyncadd (%p710_p7), %s196_s5, 4294966272  ;;  %p225_p9 = scmp.lt.s32.totalorder %s693_s19, 2  ;;  %p479_p8 = scmp.ne.s32.totalorder %s693_s19, 0 }
  0x32   : > { %v566_v0 = vld [vmem:[%s830_s0] sm:$0xff] (!%p479_p8)  }
  0x33   : > { %s768_s30 = scalar_select %p225_p9, %s693_s19, 2 }
  0x34   : > { %235 = sbr.rel (%p479_p8) target bundleno = 59 (0x3b), region = 44  ;;  %244 = vst [vmem:[#allocation2] sm:$0xff] (!%p479_p8), %v566_v0 }
  0x35   : > { %s227_s7 = scalar_lea.vmem %s832_s2, %s768_s30  ;;  %s230_s11 = scalar_lea.vmem %s833_s3, %s768_s30 }
  0x3b PF: > { %v567_v1 = vld [vmem:[%s760_s9] sm:$0xff]   ;;  %v646_v2 = vmov 0.0   ;;  %v568_v3 = vld [vmem:[%s760_s9 + $0x8] sm:$0xff]   ;;  %vm647_vm0 = vmmov 0   ;;  %v569_v4 = vld [vmem:[%s760_s9 + $0x10] sm:$0xff]   ;;  %v379_v37 = vlaneseq  ;;  %p489_p7 = scmp.ne.s32.totalorder %s693_s19, 2 }
  0x3c   : > { %502 = vmatprep.subr.bf16.mxu0 %v646_v2  ;;  %518 = vmatprep.mubr.msk.bf16.mxu0 %vm647_vm0, %v646_v2  ;;  %v570_v5 = vld [vmem:[%s760_s9 + $0x18] sm:$0xff]   ;;  %v571_v6 = vld [vmem:[%s760_s9 + $0x20] sm:$0xff]   ;;  %v572_v7 = vld [vmem:[%s760_s9 + $0x28] sm:$0xff]   ;;  %v648_v52 = vmov (!%p489_p7), 0.0  }
  0x3d   : > { %503 = vmatpush3.bf16.msra.mxu0 %v567_v1  ;;  %v573_v8 = vld [vmem:[%s760_s9 + $0x30] sm:$0xff]   ;;  %v574_v9 = vld [vmem:[%s760_s9 + $0x38] sm:$0xff]   ;;  %v380_v38 = vshrl.u32 %v379_v37, 7  ;;  %413 = vst [vmem:[%s834_s4 + $0x8] sm:$0xff] (!%p489_p7), %v648_v52 }
  0x3e   : > { %504 = vmatprep.subr.bf16.mxu0 %v646_v2  ;;  %v245_v10 = vld [vmem:[#allocation2] sm:$0xff] }
  0x3f   : > { %v374_v39 = vld [vmem:[%s227_s7] sm:$0x1]  ;;  %v381_v40 = vsub.s32 0, %v380_v38 }
  0x40   : > { %v376_v43 = vld [vmem:[%s230_s11] sm:$0x1] }
  0x41   : > { %505 = vmatpush3.bf16.msra.mxu0 %v568_v3 }
  0x42   : > { %506 = vmatprep.subr.bf16.mxu0 %v646_v2 }
  0x45   : > { %507 = vmatpush3.bf16.msra.mxu0 %v569_v4 }
  0x46   : > { %508 = vmatprep.subr.bf16.mxu0 %v646_v2 }
  0x49   : > { %509 = vmatpush3.bf16.msra.mxu0 %v570_v5 }
  0x4a   : > { %510 = vmatprep.subr.bf16.mxu0 %v646_v2 }
  0x4d   : > { %511 = vmatpush3.bf16.msra.mxu0 %v571_v6 }
  0x4e   : > { %512 = vmatprep.subr.bf16.mxu0 %v646_v2 }
  0x51   : > { %513 = vmatpush3.bf16.msra.mxu0 %v572_v7 }
  0x52   : > { %514 = vmatprep.subr.bf16.mxu0 %v646_v2 }
  0x55   : > { %515 = vmatpush3.bf16.msra.mxu0 %v573_v8 }
  0x56   : > { %516 = vmatprep.subr.bf16.mxu0 %v646_v2 }
  0x59   : > { %517 = vmatpush3.bf16.msra.mxu0 %v574_v9 }
  0x5c   : > { %519 = vmatmul.mubr.bf16.vlgmr.msra.gmra.mrb[0].mxu0 %v245_v10 }
 0x12f   : > { %v344_v11 = vpop.f32.mrb[0].mxu0 }
 0x130   : > { %v520_v12 = vpop.f32.mrb[1].mxu0  ;;  %v358_v14 = vmul.f32 %v344_v11, %v344_v11 }
 0x131   : > { %v347_v13 = vpop.f32.mrb[2].mxu0 }
 0x132   : > { %v351_v15 = vadd.f32 %v347_v13, %v344_v11  ;;  %v359_v16 = vmul.f32 %v347_v13, %v347_v13  ;;  %v521_v17 = vpop.f32.mrb[3].mxu0 }
 0x134   : > { %v352_v18 = vrot.slane %v351_v15, 4  ;;  %v360_v19 = vadd.f32 %v359_v16, %v358_v14 }
 0x136   : > { %v353_v20 = vadd.f32 %v352_v18, %v351_v15  ;;  %v361_v21 = vrot.slane %v360_v19, 4 }
 0x138   : > { %v354_v22 = vrot.slane %v353_v20, 2  ;;  %v362_v23 = vadd.f32 %v361_v21, %v360_v19 }
 0x13a   : > { %v355_v24 = vadd.f32 %v354_v22, %v353_v20  ;;  %v363_v25 = vrot.slane %v362_v23, 2 }
 0x13c   : > { %v356_v26 = vrot.slane %v355_v24, 1  ;;  %v364_v27 = vadd.f32 %v363_v25, %v362_v23 }
 0x13e   : > { %v357_v28 = vadd.f32 %v356_v26, %v355_v24  ;;  %v365_v29 = vrot.slane %v364_v27, 1 }
 0x140   : > { %v366_v30 = vadd.f32 %v365_v29, %v364_v27  ;;  %v367_v31 = vmul.f32 0.125, %v357_v28 }
 0x142   : > { %v368_v32 = vmul.f32 0.125, %v366_v30  ;;  %v369_v33 = vmul.f32 %v367_v31, %v367_v31 }
 0x144   : > { %v370_v34 = vsub.f32 %v368_v32, %v369_v33 }
 0x146   : > { %v371_v35 = vmax.f32 %v370_v34, 0.0 }
 0x148   : > { %v372_v36 = vadd.f32 1e-05, %v371_v35 }
 0x14a   : > { %575 = vrsqrt.f32 %v372_v36 }
 0x154   : > { %v576_v41 = vpop.eup %575 }
 0x155   : > { %v375_v42 = vmul.f32 %v576_v41, %v374_v39 }
 0x157   : > { %v377_v44 = vmul.f32 %v375_v42, %v367_v31  ;;  %v382_v45 = vrot.slane %v375_v42, %v381_v40 }
 0x159   : > { %v378_v46 = vsub.f32 %v376_v43, %v377_v44  ;;  %v383_v47 = vmul.f32 %v382_v45, %v344_v11 }
 0x15b   : > { %v389_v48 = vrot.slane %v378_v46, %v381_v40 }
 0x15d   : > { %v391_v49 = vadd.f32 %v389_v48, %v383_v47  ;;  %411 = sbr.rel (%p489_p7) target bundleno = 356 (0x164), region = 48 }
 0x15f   : > { %v393_v50 = vmax.f32 %v391_v49, 0.0 }
 0x161   : > { %v406_v51 = vpack.c.bf16 %v646_v2, %v393_v50  ;;  %412 = vst [vmem:[%s834_s4] sm:$0xff] (!%p489_p7), %v393_v50 }
 0x163   : > { %407 = vst [vmem:[#allocation2] sm:$0xff] %v406_v51 }
 0x164 PF: > { %p14_p4 = scmp.ge.s32.totalorder %s696_s20, 5   ;;  %s838_s15 = smov %s633_s16 }
 0x165   : > { %s839_s16 = smov %s637_s17  ;;  %s840_s17 = smov %s706_s23 }
 0x166   : > { %s841_s18 = smov %s696_s20  ;;  %16 = sbr.rel (!%p14_p4) target bundleno = 3 (0x3), region = 86 }
 0x16d   :  { %425 = vsyncpa [#allocation4], 1 }
 0x16e   :  { %427 = vsyncpa [#allocation4 + $0x1], 1 }

</bundles_post_ra>
